<compile_context>
chip_gen: v6e
topology: v6e:2x2x1
jax: 0.10.0
libtpu: 0.0.40
codegen_flags: <defaults>
</compile_context>

<pallas_src>
import functools

import numpy as np
import jax
import jax.numpy as jnp
from jax.experimental import pallas as pl
from jax.experimental.pallas import tpu as pltpu


def _categorical_activation_kernel(num_classes, keep_activation_size, rnd_pairs,
                                   x_ref,      # (S,  TN)  raw x
                                   bnd_ref,    # (NB, TN)  raw boundary values
                                   cat_ref,    # (1,  TN)  float 0/1 mask
                                   ord_ref,    # (1,  TN)  float 0/1 mask
                                   o_ref):     # (S,  TN)
    x = x_ref[...].astype(jnp.float32)

    # Softsign via EUP approximate reciprocal (frees VALU slots).
    xs = x * pl.reciprocal(1.0 + jnp.abs(x), approx=True)

    # Quantize: count boundaries strictly below each value (integer accum).
    # Raw-x comparison is equivalent to the softsign comparison (monotone).
    cnt = jnp.zeros(x.shape, dtype=jnp.int32)
    for k in range(bnd_ref.shape[0]):                   # static, small (<= 8)
        cnt = cnt + (x > bnd_ref[pl.ds(k, 1), :]).astype(jnp.int32)

    cat_val = cnt.astype(jnp.float32) - jnp.float32(num_classes / 2.0)

    cat_m = cat_ref[...] > jnp.float32(0.5)             # (1, TN) broadcasts over S
    val = jnp.where(cat_m, cat_val, xs)

    # randomize_classes at ordered positions: (cnt - nc/2) == c  ->  perm[c].
    # Only the statically reachable (cnt, perm) pairs are checked (empty for
    # odd num_classes -> result 0, matching the reference).
    rnd = jnp.zeros(x.shape, dtype=jnp.float32)
    for cnt_match, perm_val in rnd_pairs:               # static, <= nc/2 iters
        rnd = rnd + jnp.where(cnt == cnt_match,
                              jnp.float32(perm_val), jnp.float32(0.0))
    ord_m = ord_ref[...] > jnp.float32(0.5)             # (1, TN)
    out = jnp.where(ord_m, rnd, val)

    if keep_activation_size:
        hid = jnp.mean(jnp.abs(xs), axis=0, keepdims=True)   # (1, TN)
        out = out * hid

    o_ref[...] = out.astype(o_ref.dtype)


def categorical_activation(x, boundaries, cat_mask, ord_mask, rnd_pairs,
                           num_classes, keep_activation_size=False):
    S, B, H = x.shape
    nbp = boundaries.shape[0]
    N = B * H

    # Fold B into the lane axis (contiguous reshape, free).
    x2 = x.reshape(S, N)
    bnd2 = boundaries.reshape(nbp, N)
    cat2 = cat_mask.reshape(1, N)
    ord2 = ord_mask.reshape(1, N)

    # ---- lane-tile selection: as large as the VMEM budget allows ----
    try:
        vmem_cap = int(pltpu.get_tpu_info().vmem_capacity_bytes)
    except Exception:
        vmem_cap = 64 * 1024 * 1024          # conservative fallback (v7x per-TC)
    budget = vmem_cap // 4                   # headroom for double buffering
    bytes_per_lane = 2 * (2 * S + nbp + 2) * 4   # double-buffered f32 in+out tiles
    tn_groups_budget = max(1, budget // (bytes_per_lane * 128))

    n128 = pl.cdiv(N, 128)                   # 128-lane groups (after padding)
    if n128 >= 2:
        # keep >= 2 grid steps so v7x's two TensorCores both get work
        tn_groups = min(tn_groups_budget, max(1, n128 // 2))
    else:
        tn_groups = 1
    tn = tn_groups * 128
    grid_n = pl.cdiv(n128, tn_groups)
    Np = grid_n * tn

    if Np != N:                              # pad lane axis to a 128-multiple tile
        pad = Np - N
        x2 = jnp.pad(x2, ((0, 0), (0, pad)))
        bnd2 = jnp.pad(bnd2, ((0, 0), (0, pad)))
        cat2 = jnp.pad(cat2, ((0, 0), (0, pad)))
        ord2 = jnp.pad(ord2, ((0, 0), (0, pad)))

    pipeline_bytes = bytes_per_lane * tn
    vmem_limit = int(min(vmem_cap,
                         max(32 * 1024 * 1024, pipeline_bytes + (8 << 20))))

    kernel = functools.partial(_categorical_activation_kernel,
                               num_classes, keep_activation_size,
                               tuple(rnd_pairs))

    out2 = pl.pallas_call(
        kernel,
        out_shape=jax.ShapeDtypeStruct((S, Np), x.dtype),
        grid_spec=pltpu.PrefetchScalarGridSpec(
            num_scalar_prefetch=0,
            grid=(grid_n,),
            in_specs=[
                pl.BlockSpec((S, tn), lambda j: (0, j)),
                pl.BlockSpec((nbp, tn), lambda j: (0, j)),
                pl.BlockSpec((1, tn), lambda j: (0, j)),
                pl.BlockSpec((1, tn), lambda j: (0, j)),
            ],
            out_specs=pl.BlockSpec((S, tn), lambda j: (0, j)),
        ),
        compiler_params=pltpu.CompilerParams(
            dimension_semantics=("parallel",),
            vmem_limit_bytes=vmem_limit),
    )(x2, bnd2, cat2, ord2)

    return out2[:, :N].reshape(S, B, H)


if __name__ == "__main__":
    S, B, H = 8, 4, 256
    categorical_p, ordered_p = 0.1, 0.7
    keep_activation_size = False

    key = jax.random.PRNGKey(0)
    k_nc, k_x, k_cat, k_ord, k_idx, k_perm = jax.random.split(key, 6)

    # zipf_sampler_f(0.8, 1, 10): support [1, 10), weights ∝ k^-0.8 (deterministic)
    support = np.arange(1, 10)
    w = support.astype(np.float64) ** (-0.8)
    w /= w.sum()
    u = float(jax.random.uniform(k_nc, ()))
    num_classes = int(support[int(np.searchsorted(np.cumsum(w), u))])

    x = jax.random.normal(k_x, (S, B, H), dtype=jnp.float32) * 2.0

    cat_mask = (jax.random.uniform(k_cat, (B, H)) < categorical_p).astype(jnp.float32)
    ord_mask = ((jax.random.uniform(k_ord, (B, H)) < ordered_p).astype(jnp.float32)
                * cat_mask)  # logical_and(ordered, categorical)

    nb = num_classes - 1
    if nb > 0:
        idx = jax.random.randint(k_idx, (nb, B, H), 0, S)
        # Gather RAW x values; the kernel compares raw x > raw boundary, which
        # equals the softsign comparison because softsign is strictly monotone.
        boundaries = jnp.take_along_axis(x, idx, axis=0)
    else:
        # num_classes == 1: no boundaries -> count is always 0 (+inf sentinel).
        boundaries = jnp.full((1, B, H), jnp.inf, dtype=jnp.float32)

    # Static class-randomization table: cnt - nc/2 == c can only hold for a
    # few (cnt, c) pairs (none when num_classes is odd, matching the reference).
    perm_np = np.asarray(jax.random.permutation(k_perm, num_classes))
    rnd_pairs = []
    for c in range(num_classes):
        t = c + num_classes / 2.0
        if t == int(t) and 0 <= int(t) <= num_classes - 1:
            rnd_pairs.append((int(t), float(perm_np[c])))

    out = categorical_activation(x, boundaries, cat_mask, ord_mask, rnd_pairs,
                                 num_classes, keep_activation_size)
    jax.block_until_ready(out)
    assert out.shape == (S, B, H) and out.dtype == jnp.float32
    print("KERNEL_OK")
</pallas_src>

<mosaic_0001>
module attributes {stable_mosaic.version = 11 : i64} {
  func.func @_categorical_activation_kernel(%arg0: i32, %arg1: memref<8x512xf32, #tpu.memory_space<vmem>>, %arg2: memref<6x512xf32, #tpu.memory_space<vmem>>, %arg3: memref<1x512xf32, #tpu.memory_space<vmem>>, %arg4: memref<1x512xf32, #tpu.memory_space<vmem>>, %arg5: memref<8x512xf32, #tpu.memory_space<vmem>>) attributes {dimension_semantics = [#tpu.dimension_semantics<parallel>], iteration_bounds = array<i64: 2>, scalar_prefetch = 0 : i64, scratch_operands = 0 : i64, tpu.core_type = #tpu.core_type<tc>, window_params = [{transform_indices = @transform_0, window_bounds = array<i64: 8, 512>}, {transform_indices = @transform_1, window_bounds = array<i64: 6, 512>}, {transform_indices = @transform_2, window_bounds = array<i64: 1, 512>}, {transform_indices = @transform_3, window_bounds = array<i64: 1, 512>}, {transform_indices = @transform_4, window_bounds = array<i64: 8, 512>}]} {
    %c0 = arith.constant 0 : index
    %c0_0 = arith.constant 0 : index
    %0 = vector.load %arg1[%c0, %c0_0] : memref<8x512xf32, #tpu.memory_space<vmem>>, vector<8x512xf32>
    %1 = math.absf %0 : vector<8x512xf32>
    %cst = arith.constant 1.000000e+00 : f32
    %2 = vector.broadcast %cst : f32 to vector<8x512xf32>
    %3 = arith.addf %2, %1 : vector<8x512xf32>
    %4 = tpu.reciprocal %3 {approx = true} : vector<8x512xf32> -> vector<8x512xf32>
    %5 = arith.mulf %0, %4 : vector<8x512xf32>
    %c0_i32 = arith.constant 0 : i32
    %6 = vector.broadcast %c0_i32 : i32 to vector<8x512xi32>
    %c0_1 = arith.constant 0 : index
    %c0_2 = arith.constant 0 : index
    %7 = vector.load %arg2[%c0_1, %c0_2] : memref<6x512xf32, #tpu.memory_space<vmem>>, vector<1x512xf32>
    %8 = vector.broadcast %7 : vector<1x512xf32> to vector<8x512xf32>
    %9 = arith.cmpf ogt, %0, %8 : vector<8x512xf32>
    %10 = arith.extui %9 : vector<8x512xi1> to vector<8x512xi32>
    %11 = arith.addi %6, %10 : vector<8x512xi32>
    %c1 = arith.constant 1 : index
    %c0_3 = arith.constant 0 : index
    %12 = vector.load %arg2[%c1, %c0_3] : memref<6x512xf32, #tpu.memory_space<vmem>>, vector<1x512xf32>
    %13 = vector.broadcast %12 : vector<1x512xf32> to vector<8x512xf32>
    %14 = arith.cmpf ogt, %0, %13 : vector<8x512xf32>
    %15 = arith.extui %14 : vector<8x512xi1> to vector<8x512xi32>
    %16 = arith.addi %11, %15 : vector<8x512xi32>
    %c2 = arith.constant 2 : index
    %c0_4 = arith.constant 0 : index
    %17 = vector.load %arg2[%c2, %c0_4] : memref<6x512xf32, #tpu.memory_space<vmem>>, vector<1x512xf32>
    %18 = vector.broadcast %17 : vector<1x512xf32> to vector<8x512xf32>
    %19 = arith.cmpf ogt, %0, %18 : vector<8x512xf32>
    %20 = arith.extui %19 : vector<8x512xi1> to vector<8x512xi32>
    %21 = arith.addi %16, %20 : vector<8x512xi32>
    %c3 = arith.constant 3 : index
    %c0_5 = arith.constant 0 : index
    %22 = vector.load %arg2[%c3, %c0_5] : memref<6x512xf32, #tpu.memory_space<vmem>>, vector<1x512xf32>
    %23 = vector.broadcast %22 : vector<1x512xf32> to vector<8x512xf32>
    %24 = arith.cmpf ogt, %0, %23 : vector<8x512xf32>
    %25 = arith.extui %24 : vector<8x512xi1> to vector<8x512xi32>
    %26 = arith.addi %21, %25 : vector<8x512xi32>
    %c4 = arith.constant 4 : index
    %c0_6 = arith.constant 0 : index
    %27 = vector.load %arg2[%c4, %c0_6] : memref<6x512xf32, #tpu.memory_space<vmem>>, vector<1x512xf32>
    %28 = vector.broadcast %27 : vector<1x512xf32> to vector<8x512xf32>
    %29 = arith.cmpf ogt, %0, %28 : vector<8x512xf32>
    %30 = arith.extui %29 : vector<8x512xi1> to vector<8x512xi32>
    %31 = arith.addi %26, %30 : vector<8x512xi32>
    %c5 = arith.constant 5 : index
    %c0_7 = arith.constant 0 : index
    %32 = vector.load %arg2[%c5, %c0_7] : memref<6x512xf32, #tpu.memory_space<vmem>>, vector<1x512xf32>
    %33 = vector.broadcast %32 : vector<1x512xf32> to vector<8x512xf32>
    %34 = arith.cmpf ogt, %0, %33 : vector<8x512xf32>
    %35 = arith.extui %34 : vector<8x512xi1> to vector<8x512xi32>
    %36 = arith.addi %31, %35 : vector<8x512xi32>
    %37 = arith.sitofp %36 : vector<8x512xi32> to vector<8x512xf32>
    %cst_8 = arith.constant 3.500000e+00 : f32
    %38 = vector.broadcast %cst_8 : f32 to vector<8x512xf32>
    %39 = arith.subf %37, %38 : vector<8x512xf32>
    %c0_9 = arith.constant 0 : index
    %c0_10 = arith.constant 0 : index
    %40 = vector.load %arg3[%c0_9, %c0_10] : memref<1x512xf32, #tpu.memory_space<vmem>>, vector<1x512xf32>
    %cst_11 = arith.constant 5.000000e-01 : f32
    %41 = vector.broadcast %cst_11 : f32 to vector<1x512xf32>
    %42 = arith.cmpf ogt, %40, %41 : vector<1x512xf32>
    %43 = vector.shape_cast %42 : vector<1x512xi1> to vector<1x512xi1>
    %44 = vector.broadcast %43 : vector<1x512xi1> to vector<8x512xi1>
    %45 = arith.select %44, %39, %5 : vector<8x512xi1>, vector<8x512xf32>
    %cst_12 = arith.constant 0.000000e+00 : f32
    %46 = vector.broadcast %cst_12 : f32 to vector<8x512xf32>
    %c0_13 = arith.constant 0 : index
    %c0_14 = arith.constant 0 : index
    %47 = vector.load %arg4[%c0_13, %c0_14] : memref<1x512xf32, #tpu.memory_space<vmem>>, vector<1x512xf32>
    %cst_15 = arith.constant 5.000000e-01 : f32
    %48 = vector.broadcast %cst_15 : f32 to vector<1x512xf32>
    %49 = arith.cmpf ogt, %47, %48 : vector<1x512xf32>
    %50 = vector.shape_cast %49 : vector<1x512xi1> to vector<1x512xi1>
    %51 = vector.broadcast %50 : vector<1x512xi1> to vector<8x512xi1>
    %52 = arith.select %51, %46, %45 : vector<8x512xi1>, vector<8x512xf32>
    %c0_16 = arith.constant 0 : index
    %c0_17 = arith.constant 0 : index
    %53 = vector.load %arg5[%c0_16, %c0_17] : memref<8x512xf32, #tpu.memory_space<vmem>>, vector<8x512xf32>
    tpu.vector_store %arg5[%c0_16, %c0_17], %52 {strides = array<i32>} : memref<8x512xf32, #tpu.memory_space<vmem>>, vector<8x512xf32>,
    return
  }
  func.func @transform_0(%arg0: i32) -> (i32, i32) {
    %c0_i32 = arith.constant 0 : i32
    %c0_i32_0 = arith.constant 0 : i32
    return %c0_i32, %arg0 : i32, i32
  }
  func.func @transform_1(%arg0: i32) -> (i32, i32) {
    %c0_i32 = arith.constant 0 : i32
    %c0_i32_0 = arith.constant 0 : i32
    return %c0_i32, %arg0 : i32, i32
  }
  func.func @transform_2(%arg0: i32) -> (i32, i32) {
    %c0_i32 = arith.constant 0 : i32
    %c0_i32_0 = arith.constant 0 : i32
    return %c0_i32, %arg0 : i32, i32
  }
  func.func @transform_3(%arg0: i32) -> (i32, i32) {
    %c0_i32 = arith.constant 0 : i32
    %c0_i32_0 = arith.constant 0 : i32
    return %c0_i32, %arg0 : i32, i32
  }
  func.func @transform_4(%arg0: i32) -> (i32, i32) {
    %c0_i32 = arith.constant 0 : i32
    %c0_i32_0 = arith.constant 0 : i32
    return %c0_i32, %arg0 : i32, i32
  }
}

</mosaic_0001>

<bundles_post_ra>
// kernel: tpu_custom_call.1
= control target key start
LH: loop header
LB: loop body
LE: loop exit
PB: predicated region body
PF: predicated region fallthrough
CT: control target
= control target key end

     0   :  { %s1550_s0 = inlined_call_operand.hbm [shape: f32[8,1024], index: 0, kind: input, shape index: {}]   ;;  %s1551_s1 = inlined_call_operand.hbm [shape: f32[6,1024], index: 1, kind: input, shape index: {}]   ;;  %s1552_s2 = inlined_call_operand.hbm [shape: f32[1,1024], index: 2, kind: input, shape index: {}]   ;;  %s1553_s3 = inlined_call_operand.hbm [shape: f32[1,1024], index: 3, kind: input, shape index: {}]   ;;  %s1554_s4 = inlined_call_operand.hbm [shape: f32[8,1024], index: 4, kind: output, shape index: {}]  }
   0x1   :  { %1559 = sst [smem:[#allocation16_spill]] %s1550_s0 }
   0x2   :  { %1560 = sst [smem:[#allocation17_spill]] %s1551_s1 }
   0x3   :  { %9 = vsyncpa [#allocation3], 0 }
   0x4   :  { %11 = vsyncpa [#allocation3 + $0x1], 0 }
   0x5   :  { %12 = vsyncpa [#allocation6], 0 }
   0x6   :  { %14 = vsyncpa [#allocation6 + $0x1], 0 }
   0x7   :  { %15 = vsyncpa [#allocation9], 0 }
   0x8   :  { %17 = vsyncpa [#allocation9 + $0x1], 0 }
   0x9   :  { %18 = vsyncpa [#allocation4], 0 }
   0xa   :  { %20 = vsyncpa [#allocation4 + $0x1], 0  ;;  %s1099_s15 = smov 0   ;;  %s1101_s16 = smov 0  }
   0xb   :  { %s1103_s17 = smov 0   ;;  %s1105_s18 = smov 0  }
   0xc LB: > { %s1120_s19 = sadd.s32 4294967295, %s1066_s18   ;;  %s772_s20 = sadd.s32 4294967294, %s1066_s18   ;;  %s1066_s18 = sphi %s1105_s18, %s1592_s18   ;;  %s1062_s17 = sphi %s1103_s17, %s1591_s17   ;;  %s1058_s16 = sphi %s1101_s16, %s1590_s16   ;;  %s1054_s15 = sphi %s1099_s15, %s1589_s15  }
   0xd   : > { %s1124_s21 = sadd.s32 1, %s1066_s18   ;;  %s33_s22 = sadd.s32 1, %s1062_s17 }
   0xe   : > { %s30_s23 = ssub.s32 %s1066_s18, %s1124_s21  ;;  %p40_p0 = scmp.ne.s32.totalorder %s1062_s17, %s1058_s16 }
   0xf   : > { %p31_p1 = scmp.eq.s32.totalorder %s30_s23, 0  ;;  %p41_p2 = scmp.eq.s32.totalorder %s1066_s18, 0 }
  0x10   : > { %p46_p3 = scmp.ne.s32.totalorder %s1058_s16, %s1054_s15  ;;  %p47_p4 = scmp.eq.s32.totalorder %s1120_s19, 0 }
  0x11   : > { %s1136_s24 = scalar_select %p31_p1, %s1062_s17, %s33_s22  }
  0x12   : > { %p42_p5 = por %p41_p2, %p40_p0  ;;  %p1138_p6 = por %p47_p4, %p46_p3 }
  0x13   : > { %1561 = sst [smem:[#allocation15_spill]] %s1136_s24  ;;  %p148_p7 = scmp.eq.s32.totalorder %s1120_s19, 1 }
  0x14   : > { %s1562_s25 = scalar_select %p1138_p6, 1, 0 }
  0x15   : > { %p154_p8 = scmp.eq.s32.totalorder %s772_s20, 1  ;;  %p839_p10 = scmp.lt.s32.totalorder %s1066_s18, 2 }
  0x16   : > { %p1145_p11 = por %p148_p7, %p40_p0  ;;  %s1154_s28 = sand.u32 1, %s1062_s17  }
  0x17   : > { %p1149_p12 = por %p154_p8, %p46_p3  ;;  %s1556_s29 = sshll.u32 %s1066_s18, 9 }
  0x18   : > { %s1563_s26 = scalar_select %p1145_p11, 1, 0 }
  0x19   : > { %s1564_s27 = scalar_select %p1149_p12, 1, 0 }
  0x1a   : > { %s1555_s30 = sshll.u32 %s1154_s28, 5  ;;  %p1158_p13 = pnand %p839_p10, %p42_p5 }
  0x1b   : > { %s193_s6 = sand.u32 1, %s1066_s18   ;;  %s1566_s1 = sld [smem:[#allocation17_spill]] }
  0x1c   : > { %s197_s10 = scalar_lea.vmem [#allocation5], %s1555_s30  ;;  %s1173_s12 = scalar_lea.sflag [#allocation6], %s193_s6 }
  0x1d   : > { %s205_s11 = sshll.u32 %s197_s10, 4  ;;  %p1179_p2 = pneg %p1158_p13  ;;  %s206_s11 = int_to_ptr.vmem [resolvable:$true] %s205_s11 }
  0x21   : > { %s1168_s9 = scalar_lea.hbm %s1566_s1, %s1556_s29  ;;  %s887_s23 = scalar_lea.hbm %s1566_s1, 1024 }
  0x22   : > { %s882_s13 = scalar_lea.hbm %s1168_s9, 512  ;;  %p888_p5 = scmp.lt.s32.totalorder %s1168_s9, %s1566_s1 }
  0x23   : > { %p883_p1 = scmp.ne.s32.totalorder %s1168_s9, %s882_s13  ;;  %p889_p7 = scmp.lt.s32.totalorder %s887_s23, %s882_s13 }
  0x25   : > { %p885_p3 = pnand %p1179_p2, %p883_p1  ;;  %p890_p8 = por %p889_p7, %p888_p5 }
  0x27   : > { %p886_p4 = pneg %p885_p3 }
  0x29   : > { %p891_p10 = pnand %p890_p8, %p886_p4 }
  0x2b   : > { %894 = shalt.err (!%p891_p10)
}
  0x2c   : > { %s895_s6 = scalar_lea.vmem %s206_s11, 512  ;;  %s1068_s10 = smov [#allocation5]  }
  0x2d   : > { %p896_p9 = scmp.ne.s32.totalorder %s206_s11, %s895_s6  ;;  %s900_s30 = sshll.u32 %s1068_s10, 4  ;;  %s901_s30 = int_to_ptr.vmem [resolvable:$false] %s900_s30 }
  0x2e   : > { %s902_s29 = scalar_lea.vmem %s901_s30, 1024  ;;  %p903_p1 = scmp.lt.s32.totalorder %s206_s11, %s901_s30 }
  0x2f   : > { %p898_p0 = pnand %p896_p9, %p1179_p2  ;;  %p904_p3 = scmp.lt.s32.totalorder %s902_s29, %s895_s6 }
  0x31   : > { %p899_p12 = pneg %p898_p0  ;;  %p905_p11 = por %p904_p3, %p903_p1 }
  0x33   : > { %p906_p6 = pnand %p905_p11, %p899_p12 }
  0x35   : > { %909 = shalt.err (!%p906_p6)
}
  0x36   : > { %828 = dma.hbm_to_vmem [thread:$0]  (!%p1158_p13), %s1168_s9, 512, %s206_s11, %s1173_s12  }
  0x37   : > { %p248_p9 = scmp.lt.s32.totalorder %s1066_s18, 3  ;;  %s1568_s13 = sshll.u32 %s1066_s18, 9 }
  0x38   : > { %s1569_s0 = sld [smem:[#allocation16_spill]]  ;;  %p1570_p6 = scmp.ge.s32.totalorder %s1066_s18, 1 }
  0x39   : > { %s1572_s23 = sshll.u32 %s1154_s28, 5  ;;  %s175_s11 = scalar_lea.sflag [#allocation3], %s1154_s28 }
  0x3a   : > { %p1208_p11 = pnand %p1570_p6, %p248_p9  ;;  %s178_s7 = scalar_lea.vmem [#allocation2], %s1572_s23 }
  0x3b   : > { %s186_s8 = sshll.u32 %s178_s7, 4  ;;  %s187_s8 = int_to_ptr.vmem [resolvable:$true] %s186_s8 }
  0x3c   : > { %s1571_s22 = scalar_select %p1208_p11, 1, 0 }
  0x3e   : > { %s1204_s29 = scalar_lea.hbm %s1569_s0, %s1568_s13  ;;  %s915_s20 = scalar_lea.hbm %s1569_s0, 1024 }
  0x3f   : > { %s910_s6 = scalar_lea.hbm %s1204_s29, 512  ;;  %p916_p5 = scmp.lt.s32.totalorder %s1204_s29, %s1569_s0 }
  0x40   : > { %p911_p12 = scmp.ne.s32.totalorder %s1204_s29, %s910_s6  ;;  %p917_p7 = scmp.lt.s32.totalorder %s915_s20, %s910_s6 }
  0x42   : > { %p913_p0 = pnand %p911_p12, %p1179_p2  ;;  %p918_p8 = por %p917_p7, %p916_p5 }
  0x44   : > { %p914_p4 = pneg %p913_p0 }
  0x46   : > { %p919_p10 = pnand %p918_p8, %p914_p4 }
  0x48   : > { %922 = shalt.err (!%p919_p10)
}
  0x49   : > { %s923_s23 = scalar_lea.vmem %s187_s8, 512  ;;  %s1069_s7 = smov [#allocation2]  }
  0x4a   : > { %p924_p1 = scmp.ne.s32.totalorder %s187_s8, %s923_s23  ;;  %s928_s9 = sshll.u32 %s1069_s7, 4  ;;  %s929_s9 = int_to_ptr.vmem [resolvable:$false] %s928_s9 }
  0x4b   : > { %s930_s24 = scalar_lea.vmem %s929_s9, 1024  ;;  %p931_p6 = scmp.lt.s32.totalorder %s187_s8, %s929_s9 }
  0x4c   : > { %p926_p3 = pnand %p924_p1, %p1179_p2  ;;  %p932_p12 = scmp.lt.s32.totalorder %s930_s24, %s923_s23 }
  0x4e   : > { %p927_p9 = pneg %p926_p3  ;;  %p933_p0 = por %p932_p12, %p931_p6 }
  0x50   : > { %p934_p11 = pnand %p933_p0, %p927_p9 }
  0x52   : > { %937 = shalt.err (!%p934_p11)
}
  0x53   : > { %825 = dma.hbm_to_vmem [thread:$0]  (!%p1158_p13), %s1204_s29, 512, %s187_s8, %s175_s11  }
  0x54   : > { %s809_s1 = sshll.u32 %s1066_s18, 6  ;;  %s1573_s20 = sshll.u32 %s1154_s28, 2 }
  0x55   : > { %s222_s13 = scalar_lea.hbm %s1552_s2, %s809_s1  ;;  %s216_s9 = scalar_lea.vmem [#allocation7], %s1573_s20 }
  0x56   : > { %s224_s24 = sshll.u32 %s216_s9, 4  ;;  %s938_s30 = scalar_lea.hbm %s222_s13, 64  ;;  %s225_s24 = int_to_ptr.vmem [resolvable:$true] %s224_s24 }
  0x57   : > { %p939_p11 = scmp.ne.s32.totalorder %s222_s13, %s938_s30  ;;  %s943_s0 = scalar_lea.hbm %s1552_s2, 128 }
  0x58   : > { %p944_p7 = scmp.lt.s32.totalorder %s222_s13, %s1552_s2  ;;  %p945_p8 = scmp.lt.s32.totalorder %s943_s0, %s938_s30 }
  0x59   : > { %p941_p4 = pnand %p939_p11, %p1179_p2 }
  0x5a   : > { %p946_p10 = por %p945_p8, %p944_p7 }
  0x5b   : > { %p942_p5 = pneg %p941_p4 }
  0x5d   : > { %p947_p1 = pnand %p946_p10, %p942_p5 }
  0x5f   : > { %950 = shalt.err (!%p947_p1)
}
  0x60   : > { %s951_s11 = scalar_lea.vmem %s225_s24, 64  ;;  %s1070_s6 = smov [#allocation7]  }
  0x61   : > { %p952_p3 = scmp.ne.s32.totalorder %s225_s24, %s951_s11  ;;  %s956_s10 = sshll.u32 %s1070_s6, 4  ;;  %s957_s10 = int_to_ptr.vmem [resolvable:$false] %s956_s10 }
  0x62   : > { %s958_s20 = scalar_lea.vmem %s957_s10, 128  ;;  %p959_p12 = scmp.lt.s32.totalorder %s225_s24, %s957_s10 }
  0x63   : > { %p954_p9 = pnand %p952_p3, %p1179_p2  ;;  %p960_p0 = scmp.lt.s32.totalorder %s958_s20, %s951_s11 }
  0x65   : > { %p955_p6 = pneg %p954_p9  ;;  %p961_p11 = por %p960_p0, %p959_p12 }
  0x67   : > { %p962_p4 = pnand %p961_p11, %p955_p6 }
  0x69   : > { %965 = shalt.err (!%p962_p4)
}
  0x6a   : > { %831 = dma.hbm_to_vmem [thread:$0]  (!%p1158_p13), %s222_s13, 64, %s225_s24, %s1173_s12  }
  0x6b   : > { %s1258_s30 = scalar_lea.hbm %s1553_s3, %s809_s1  ;;  %s1574_s23 = sshll.u32 %s1154_s28, 2 }
  0x6c   : > { %s235_s7 = scalar_lea.vmem [#allocation8], %s1574_s23  ;;  %s232_s8 = scalar_lea.sflag [#allocation9], %s1154_s28 }
  0x6d   : > { %s243_s29 = sshll.u32 %s235_s7, 4  ;;  %s966_s11 = scalar_lea.hbm %s1258_s30, 64  ;;  %s244_s29 = int_to_ptr.vmem [resolvable:$true] %s243_s29 }
  0x6e   : > { %p967_p5 = scmp.ne.s32.totalorder %s1258_s30, %s966_s11  ;;  %s971_s24 = scalar_lea.hbm %s1553_s3, 128 }
  0x6f   : > { %p972_p10 = scmp.lt.s32.totalorder %s1258_s30, %s1553_s3  ;;  %p973_p1 = scmp.lt.s32.totalorder %s971_s24, %s966_s11 }
  0x70   : > { %p969_p7 = pnand %p967_p5, %p1179_p2 }
  0x71   : > { %p974_p3 = por %p973_p1, %p972_p10 }
  0x72   : > { %p970_p8 = pneg %p969_p7 }
  0x74   : > { %p975_p9 = pnand %p974_p3, %p970_p8 }
  0x76   : > { %978 = shalt.err (!%p975_p9)
}
  0x77   : > { %s979_s10 = scalar_lea.vmem %s244_s29, 64  ;;  %s1071_s28 = smov [#allocation8]  }
  0x78   : > { %p980_p6 = scmp.ne.s32.totalorder %s244_s29, %s979_s10  ;;  %s984_s20 = sshll.u32 %s1071_s28, 4  ;;  %s985_s20 = int_to_ptr.vmem [resolvable:$false] %s984_s20 }
  0x79   : > { %s986_s0 = scalar_lea.vmem %s985_s20, 128  ;;  %p987_p11 = scmp.lt.s32.totalorder %s244_s29, %s985_s20 }
  0x7a   : > { %p982_p12 = pnand %p980_p6, %p1179_p2  ;;  %p988_p4 = scmp.lt.s32.totalorder %s986_s0, %s979_s10 }
  0x7c   : > { %p983_p0 = pneg %p982_p12  ;;  %p989_p5 = por %p988_p4, %p987_p11 }
  0x7e   : > { %p990_p7 = pnand %p989_p5, %p983_p0 }
  0x80   : > { %993 = shalt.err (!%p990_p7)
}
  0x81   : > { %834 = dma.hbm_to_vmem [thread:$0]  (!%p1158_p13), %s1258_s30, 64, %s244_s29, %s232_s8  }
  0x82   : > { %p1575_p8 = scmp.ne.s32.totalorder %s1571_s22, 0 }
  0x83   : > { %s1282_s14 = sand.u32 (!%p1575_p8), 1, %s1058_s16   ;;  %p1576_p2 = scmp.ne.s32.totalorder (!%p1575_p8), %s1562_s25, 0 }
  0x84   : > { %252 = sbr.rel (%p1575_p8) target bundleno = 207 (0xcf), region = 36  ;;  %s1285_s9 = sshll.u32 (!%p1575_p8), %s1282_s14, 5 }
  0x85   : > { %s255_s23 = scalar_lea.sflag (!%p1575_p8), [#allocation3], %s1282_s14  ;;  %s1289_s7 = scalar_lea.vmem (!%p1575_p8), [#allocation2], %s1285_s9 }
  0x89   : > { %1037 = dma.done.wait (%p1576_p2), %s255_s23, 512  }
  0x8a   : > { %1039 = vsyncadd (%p1576_p2), %s255_s23, 4294966784  ;;  %s263_s5 = sand.u32 1, %s1120_s19   ;;  %s1297_s30 = scalar_lea.vmem [#allocation5], %s1285_s9 }
  0x8b   : > { %s264_s22 = scalar_lea.sflag [#allocation6], %s263_s5 }
  0x8c   : > { %1041 = dma.done.wait (%p1576_p2), %s264_s22, 576  }
  0x8d   : > { %1043 = vsyncadd (%p1576_p2), %s264_s22, 4294966720  ;;  %s790_s29 = sshll.u32 %s1282_s14, 2  ;;  %s282_s11 = scalar_lea.sflag [#allocation9], %s1282_s14 }
  0x8e   : > { %s276_s8 = scalar_lea.vmem [#allocation7], %s790_s29  ;;  %s1305_s12 = scalar_lea.vmem [#allocation8], %s790_s29 }
  0x8f   : > { %1045 = dma.done.wait (%p1576_p2), %s282_s11, 64  }
  0x90   : > { %1047 = vsyncadd (%p1576_p2), %s282_s11, 4294967232  ;;  %v352_v0 = vlaneseq  ;;  %v1320_v6 = vld [vmem:[%s1289_s7] sm:$0xff]  ;;  %v1072_v21 = vmov 0   ;;  %v590_v25 = vld [vmem:[%s1305_s12] sm:$0xf]  ;;  %s1453_s25 = scalar_lea.vmem [#allocation10], %s1285_s9 }
  0x91   : > { %v1323_v7 = vld [vmem:[%s1297_s30] ss:$8 sm:$0xf]  ;;  %v334_v9 = vand.u32 2147483647, %v1320_v6  ;;  %vm591_vm6 = vcmp.gt.f32.partialorder %v590_v25, 0.5 }
  0x92   : > { %v353_v1 = vshrl.u32 %v352_v0, 7  ;;  %v563_v8 = vld [vmem:[%s276_s8] sm:$0xf]  ;;  %v1365_v28 = vld [vmem:[%s1289_s7 + $0x8] sm:$0xff]  ;;  %v1379_v36 = vsel %vm591_vm6, 1, %v1072_v21  ;;  %v1408_v53 = vld [vmem:[%s1289_s7 + $0x10] sm:$0xff] }
  0x93   : > { %v1329_v11 = vld [vmem:[%s1297_s30 + $0x1] ss:$8 sm:$0xf]  ;;  %vm564_vm0 = vcmp.gt.f32.partialorder %v563_v8, 0.5  ;;  %v338_v17 = vadd.f32 1.0, %v334_v9  ;;  %s636_s13 = sshll.u32 %s1453_s25, 4  ;;  %s1509_s13 = int_to_ptr.vmem [resolvable:$true] %s636_s13 }
  0x94   : > { %v1311_v2 = vsub.s32 0, %v353_v1  ;;  %v1313_v3 = vsub.s32 1, %v353_v1  ;;  %v1315_v4 = vsub.s32 2, %v353_v1  ;;  %v1317_v5 = vsub.s32 3, %v353_v1  ;;  %s811_s24 = sshll.u32 %s1120_s19, 9  ;;  %s622_s28 = scalar_lea.sflag [#allocation4], %s1282_s14 }
  0x95   : > { %v1334_v13 = vld [vmem:[%s1297_s30 + $0x2] ss:$8 sm:$0xf]  ;;  %v1337_v14 = vld [vmem:[%s1297_s30 + $0x3] ss:$8 sm:$0xf]  ;;  %874 = vrcp.f32 %v338_v17  ;;  %s634_s10 = scalar_lea.hbm %s1554_s4, %s811_s24 }
  0x96   : > { %v355_v10 = vrot.slane %v1323_v7, %v1311_v2  ;;  %v386_v12 = vrot.slane %v1329_v11, %v1311_v2  ;;  %v359_v15 = vrot.slane %v1323_v7, %v1313_v3  ;;  %v390_v16 = vrot.slane %v1329_v11, %v1313_v3  ;;  %v1349_v20 = vld [vmem:[%s1297_s30 + $0x4] ss:$8 sm:$0xf]  ;;  %v1356_v24 = vld [vmem:[%s1297_s30 + $0x5] ss:$8 sm:$0xf] }
  0x97   : > { %v421_v18 = vrot.slane %v1334_v13, %v1311_v2  ;;  %v456_v19 = vrot.slane %v1337_v14, %v1311_v2  ;;  %v491_v23 = vrot.slane %v1349_v20, %v1311_v2  ;;  %v363_v26 = vrot.slane %v1323_v7, %v1315_v4  ;;  %s994_s20 = scalar_lea.vmem %s1509_s13, 512  ;;  %p1585_p10 = scmp.ne.s32.totalorder %s1563_s26, 0 }
  0x98   : > { %vm372_vm1 = vcmp.gt.f32.partialorder %v1320_v6, %v355_v10  ;;  %vm403_vm2 = vcmp.gt.f32.partialorder %v1320_v6, %v386_v12  ;;  %v1371_v31 = vsel %vm564_vm0, 1, %v1072_v21  ;;  %v526_v33 = vrot.slane %v1356_v24, %v1311_v2  ;;  %p995_p13 = scmp.ne.s32.totalorder %s1509_s13, %s994_s20  ;;  %s1073_s19 = smov [#allocation10]  }
  0x99   : > { %v376_v22 = vsel %vm372_vm1, 1, %v1072_v21  ;;  %v407_v27 = vsel %vm403_vm2, 1, %v1072_v21  ;;  %vm438_vm3 = vcmp.gt.f32.partialorder %v1320_v6, %v421_v18  ;;  %vm473_vm4 = vcmp.gt.f32.partialorder %v1320_v6, %v456_v19  ;;  %s998_s0 = sshll.u32 %s1073_s19, 4  ;;  %s999_s0 = int_to_ptr.vmem [resolvable:$false] %s998_s0 }
  0x9a   : > { %v411_v29 = vadd.s32 %v407_v27, %v376_v22  ;;  %v442_v30 = vsel %vm438_vm3, 1, %v1072_v21  ;;  %vm508_vm5 = vcmp.gt.f32.partialorder %v1320_v6, %v491_v23  ;;  %v477_v32 = vsel %vm473_vm4, 1, %v1072_v21  ;;  %p996_p1 = pnand %p995_p13, %p1585_p10  ;;  %s1000_s9 = scalar_lea.vmem %s999_s0, 1024 }
  0x9b   : > { %v394_v34 = vrot.slane %v1329_v11, %v1315_v4  ;;  %v335_v37 = vand.u32 2147483647, %v1365_v28  ;;  %vm373_vm7 = vcmp.gt.f32.partialorder %v1365_v28, %v359_v15  ;;  %v512_v38 = vsel %vm508_vm5, 1, %v1072_v21  ;;  %p1001_p9 = scmp.lt.s32.totalorder %s1509_s13, %s999_s0  ;;  %p1002_p6 = scmp.lt.s32.totalorder %s1000_s9, %s994_s20 }
  0x9c   : > { %v446_v35 = vadd.s32 %v442_v30, %v411_v29  ;;  %vm543_vm8 = vcmp.gt.f32.partialorder %v1320_v6, %v526_v33  ;;  %v569_v39 = vrot.slane %v1371_v31, %v1311_v2  ;;  %v377_v40 = vsel %vm373_vm7, 1, %v1072_v21  ;;  %v1450_v30 = vld [vmem:[%s1289_s7 + $0x18] sm:$0xff]  ;;  %p997_p3 = pneg %p996_p1 }
  0x9d   : > { %v596_v42 = vrot.slane %v1379_v36, %v1311_v2  ;;  %v339_v43 = vadd.f32 1.0, %v335_v37  ;;  %vm404_vm9 = vcmp.gt.f32.partialorder %v1365_v28, %v390_v16  ;;  %v547_v44 = vsel %vm543_vm8, 1, %v1072_v21  ;;  %p1003_p12 = por %p1002_p6, %p1001_p9 }
  0x9e   : > { %v481_v41 = vadd.s32 %v477_v32, %v446_v35  ;;  %v408_v45 = vsel %vm404_vm9, 1, %v1072_v21  ;;  %v425_v46 = vrot.slane %v1334_v13, %v1313_v3  ;;  %v460_v47 = vrot.slane %v1337_v14, %v1313_v3 }
  0x9f   : > { %876 = vrcp.f32 %v339_v43  ;;  %v412_v49 = vadd.s32 %v408_v45, %v377_v40  ;;  %v495_v50 = vrot.slane %v1349_v20, %v1313_v3  ;;  %vm1399_vm10 = vcmp.eq.s32.totalorder %v569_v39, 1  ;;  %p1004_p0 = pnand %p1003_p12, %p997_p3 }
  0xa0   : > { %v516_v48 = vadd.s32 %v512_v38, %v481_v41  ;;  %vm439_vm11 = vcmp.gt.f32.partialorder %v1365_v28, %v425_v46  ;;  %vm474_vm12 = vcmp.gt.f32.partialorder %v1365_v28, %v460_v47  ;;  %v530_v52 = vrot.slane %v1356_v24, %v1313_v3 }
  0xa1   : > { %v443_v55 = vsel %vm439_vm11, 1, %v1072_v21  ;;  %v478_v56 = vsel %vm474_vm12, 1, %v1072_v21  ;;  %vm509_vm13 = vcmp.gt.f32.partialorder %v1365_v28, %v495_v50  ;;  %vm1413_vm14 = vcmp.eq.s32.totalorder %v596_v42, 1 }
  0xa2   : > { %v551_v54 = vadd.s32 %v547_v44, %v516_v48  ;;  %v447_v58 = vadd.s32 %v443_v55, %v412_v49  ;;  %vm544_vm15 = vcmp.gt.f32.partialorder %v1365_v28, %v530_v52  ;;  %v573_v59 = vrot.slane %v1371_v31, %v1313_v3  ;;  %v875_v2 = vpop.eup %874 }
  0xa3   : > { %v513_v61 = vsel %vm509_vm13, 1, %v1072_v21  ;;  %v548_v62 = vsel %vm544_vm15, 1, %v1072_v21  ;;  %v336_v63 = vand.u32 2147483647, %v1408_v53  ;;  %vm374_vm0 = vcmp.gt.f32.partialorder %v1408_v53, %v363_v26 }
  0xa4   : > { %v555_v60 = vcvt.s32.f32 %v551_v54  ;;  %v482_v0 = vadd.s32 %v478_v56, %v447_v58  ;;  %vm405_vm1 = vcmp.gt.f32.partialorder %v1408_v53, %v394_v34  ;;  %v429_v1 = vrot.slane %v1334_v13, %v1315_v4 }
  0xa5   : > { %v600_v9 = vrot.slane %v1379_v36, %v1313_v3  ;;  %v340_v10 = vadd.f32 1.0, %v336_v63  ;;  %v378_v12 = vsel %vm374_vm0, 1, %v1072_v21  ;;  %v346_v15 = vmul.f32 %v875_v2, %v1320_v6 }
  0xa6   : > { %v798_v8 = vadd.f32 -3.5, %v555_v60  ;;  %v517_v16 = vadd.s32 %v513_v61, %v482_v0  ;;  %v409_v17 = vsel %vm405_vm1, 1, %v1072_v21  ;;  %vm440_vm2 = vcmp.gt.f32.partialorder %v1408_v53, %v429_v1 }
  0xa7   : > { %878 = vrcp.f32 %v340_v10  ;;  %v413_v18 = vadd.s32 %v409_v17, %v378_v12  ;;  %v444_v19 = vsel %vm440_vm2, 1, %v1072_v21  ;;  %v464_v22 = vrot.slane %v1337_v14, %v1315_v4 }
  0xa8   : > { %v586_v3 = vsel %vm1399_vm10, %v798_v8, %v346_v15  ;;  %v552_v23 = vadd.s32 %v548_v62, %v517_v16  ;;  %v499_v6 = vrot.slane %v1349_v20, %v1315_v4  ;;  %v534_v25 = vrot.slane %v1356_v24, %v1315_v4 }
  0xa9   : > { %v613_v26 = vsel %vm1413_vm14, 0.0, %v586_v3  ;;  %vm1444_vm3 = vcmp.eq.s32.totalorder %v573_v59, 1  ;;  %v448_v29 = vadd.s32 %v444_v19, %v413_v18  ;;  %vm475_vm4 = vcmp.gt.f32.partialorder %v1408_v53, %v464_v22 }
  0xaa   : > { %617 = vst [vmem:[%s1453_s25] sm:$0xff] %v613_v26  ;;  %v556_v32 = vcvt.s32.f32 %v552_v23  ;;  %v479_v33 = vsel %vm475_vm4, 1, %v1072_v21  ;;  %vm510_vm5 = vcmp.gt.f32.partialorder %v1408_v53, %v499_v6  ;;  %vm545_vm6 = vcmp.gt.f32.partialorder %v1408_v53, %v534_v25 }
  0xab   : > { %vm1459_vm7 = vcmp.eq.s32.totalorder %v600_v9, 1  ;;  %v483_v35 = vadd.s32 %v479_v33, %v448_v29  ;;  %v514_v37 = vsel %vm510_vm5, 1, %v1072_v21  ;;  %v577_v38 = vrot.slane %v1371_v31, %v1315_v4 }
  0xac   : > { %v877_v39 = vpop.eup %876  ;;  %v799_v40 = vadd.f32 -3.5, %v556_v32  ;;  %v549_v41 = vsel %vm545_vm6, 1, %v1072_v21  ;;  %v337_v42 = vand.u32 2147483647, %v1450_v30  ;;  %v367_v43 = vrot.slane %v1323_v7, %v1317_v5 }
  0xad   : > { %v347_v44 = vmul.f32 %v877_v39, %v1365_v28  ;;  %v518_v45 = vadd.s32 %v514_v37, %v483_v35  ;;  %v398_v46 = vrot.slane %v1329_v11, %v1317_v5  ;;  %v433_v47 = vrot.slane %v1334_v13, %v1317_v5 }
  0xae   : > { %v604_v48 = vrot.slane %v1379_v36, %v1315_v4  ;;  %v341_v49 = vadd.f32 1.0, %v337_v42  ;;  %vm375_vm8 = vcmp.gt.f32.partialorder %v1450_v30, %v367_v43  ;;  %v468_v50 = vrot.slane %v1337_v14, %v1317_v5 }
  0xaf   : > { %v587_v7 = vsel %vm1444_vm3, %v799_v40, %v347_v44  ;;  %v553_v28 = vadd.s32 %v549_v41, %v518_v45  ;;  %v379_v51 = vsel %vm375_vm8, 1, %v1072_v21  ;;  %vm406_vm9 = vcmp.gt.f32.partialorder %v1450_v30, %v398_v46 }
  0xb0   : > { %v614_v11 = vsel %vm1459_vm7, 0.0, %v587_v7  ;;  %880 = vrcp.f32 %v341_v49  ;;  %v410_v4 = vsel %vm406_vm9, 1, %v1072_v21  ;;  %vm441_vm10 = vcmp.gt.f32.partialorder %v1450_v30, %v433_v47 }
  0xb1   : > { %618 = vst [vmem:[%s1453_s25 + $0x8] sm:$0xff] %v614_v11  ;;  %v557_v13 = vcvt.s32.f32 %v553_v28  ;;  %v414_v52 = vadd.s32 %v410_v4, %v379_v51  ;;  %v445_v14 = vsel %vm441_vm10, 1, %v1072_v21  ;;  %vm476_vm11 = vcmp.gt.f32.partialorder %v1450_v30, %v468_v50 }
  0xb2   : > { %v480_v54 = vsel %vm476_vm11, 1, %v1072_v21  ;;  %v503_v55 = vrot.slane %v1349_v20, %v1317_v5  ;;  %v538_v56 = vrot.slane %v1356_v24, %v1317_v5  ;;  %vm584_vm12 = vcmp.eq.s32.totalorder %v577_v38, 1 }
  0xb3   : > { %v800_v57 = vadd.f32 -3.5, %v557_v13  ;;  %v449_v58 = vadd.s32 %v445_v14, %v414_v52  ;;  %vm611_vm15 = vcmp.eq.s32.totalorder %v604_v48, 1  ;;  %v581_v2 = vrot.slane %v1371_v31, %v1317_v5 }
  0xb4   : > { %v879_v59 = vpop.eup %878  ;;  %vm511_vm13 = vcmp.gt.f32.partialorder %v1450_v30, %v503_v55  ;;  %vm546_vm14 = vcmp.gt.f32.partialorder %v1450_v30, %v538_v56 }
  0xb5   : > { %v348_v60 = vmul.f32 %v879_v59, %v1408_v53  ;;  %v484_v61 = vadd.s32 %v480_v54, %v449_v58  ;;  %v515_v20 = vsel %vm511_vm13, 1, %v1072_v21  ;;  %v550_v62 = vsel %vm546_vm14, 1, %v1072_v21 }
  0xb6   : > { %v608_v53 = vrot.slane %v1379_v36, %v1317_v5  ;;  %vm585_vm0 = vcmp.eq.s32.totalorder %v581_v2, 1 }
  0xb7   : > { %v588_v63 = vsel %vm584_vm12, %v800_v57, %v348_v60  ;;  %v519_v24 = vadd.s32 %v515_v20, %v484_v61 }
  0xb8   : > { %v615_v0 = vsel %vm611_vm15, 0.0, %v588_v63  ;;  %vm612_vm1 = vcmp.eq.s32.totalorder %v608_v53, 1 }
  0xb9   : > { %619 = vst [vmem:[%s1453_s25 + $0x10] sm:$0xff] %v615_v0  ;;  %v554_v1 = vadd.s32 %v550_v62, %v519_v24 }
  0xbb   : > { %v558_v8 = vcvt.s32.f32 %v554_v1 }
  0xbd   : > { %v881_v9 = vpop.eup %880  ;;  %v801_v10 = vadd.f32 -3.5, %v558_v8 }
  0xbe   : > { %v349_v21 = vmul.f32 %v881_v9, %v1450_v30 }
  0xc0   : > { %v589_v12 = vsel %vm585_vm0, %v801_v10, %v349_v21 }
  0xc1   : > { %v616_v5 = vsel %vm612_vm1, 0.0, %v589_v12 }
  0xc2   : > { %620 = vst [vmem:[%s1453_s25 + $0x18] sm:$0xff] %v616_v5 }
  0xc3   : > { %1007 = shalt.err (!%p1004_p0)
}
  0xc4   : > { %s1008_s23 = scalar_lea.hbm %s634_s10, 512  ;;  %s1012_s5 = scalar_lea.hbm %s1554_s4, 1024 }
  0xc5   : > { %p1009_p11 = scmp.ne.s32.totalorder %s634_s10, %s1008_s23  ;;  %p1013_p7 = scmp.lt.s32.totalorder %s634_s10, %s1554_s4 }
  0xc6   : > { %p1014_p8 = scmp.lt.s32.totalorder %s1012_s5, %s1008_s23 }
  0xc7   : > { %p1010_p4 = pnand %p1009_p11, %p1585_p10 }
  0xc8   : > { %p1015_p2 = por %p1014_p8, %p1013_p7 }
  0xc9   : > { %p1011_p5 = pneg %p1010_p4 }
  0xcb   : > { %p1016_p13 = pnand %p1015_p2, %p1011_p5 }
  0xcd   : > { %1019 = shalt.err (!%p1016_p13)
}
  0xce   : > { %820 = dma.vmem_to_hbm [thread:$0]  (%p1585_p10), %s1509_s13, 512, %s634_s10, %s622_s28  }
  0xcf PF: > { %s648_s29 = sand.u32 1, %s1054_s15   ;;  %p1586_p1 = scmp.ne.s32.totalorder %s1564_s27, 0 }
  0xd0   : > { %p1587_p3 = scmp.ge.s32.totalorder %s1066_s18, 2  ;;  %s649_s8 = scalar_lea.sflag [#allocation4], %s648_s29 }
  0xd2   : > { %p836_p9 = pnand %p1587_p3, %p1586_p1 }
  0xd4   : > { %p837_p6 = pneg %p836_p9 }
  0xd6   : > { %1049 = dma.done.wait (%p837_p6), %s649_s8, 512  }
  0xd7   : > { %1051 = vsyncadd (%p837_p6), %s649_s8, 4294966784  ;;  %s1588_s11 = sld [smem:[#allocation15_spill]]  ;;  %p23_p12 = scmp.ge.s32.totalorder %s1124_s21, 4  }
  0xd8   : > { %s1589_s15 = smov %s1058_s16  ;;  %s1590_s16 = smov %s1062_s17 }
  0xd9   : > { %s1592_s18 = smov %s1124_s21  ;;  %25 = sbr.rel (!%p23_p12) target bundleno = 12 (0xc), region = 123 }
  0xdd   : > { %s1591_s17 = smov %s1588_s11 }
  0xde   :  { %654 = vsyncpa [#allocation3], 1 }
  0xdf   :  { %656 = vsyncpa [#allocation3 + $0x1], 1 }
  0xe0   :  { %657 = vsyncpa [#allocation6], 1 }
  0xe1   :  { %659 = vsyncpa [#allocation6 + $0x1], 1 }
  0xe2   :  { %660 = vsyncpa [#allocation9], 1 }
  0xe3   :  { %662 = vsyncpa [#allocation9 + $0x1], 1 }
  0xe4   :  { %663 = vsyncpa [#allocation4], 1 }
  0xe5   :  { %665 = vsyncpa [#allocation4 + $0x1], 1 }

</bundles_post_ra>
